<compile_context>
chip_gen: v5e
topology: v5e:2x2
jax: 0.10.0
libtpu: 0.0.40
codegen_flags: <defaults>
</compile_context>

<pallas_src>
import functools

import jax
import jax.numpy as jnp
from jax import lax
from jax.experimental import pallas as pl
from jax.experimental.pallas import tpu as pltpu

_BIG = 1e30   # finite mask sentinel (avoids inf - inf = NaN; bf16/f32 safe)
_KB = 8       # sublane height of the streaming chunks / accumulator


def _round_up(x, m):
    return ((x + m - 1) // m) * m


def _ranking_loss_kernel(c_ref, w_ref, out_ref, acc_ref, *, n_classes, k_unroll):
    """One (Lp, tb) class-major batch tile of the pairwise hinge loss.

    c_ref:   (Lp, tb) f32 -- rank where the class is a present ("correct")
             label, else +BIG.
    w_ref:   (Lp, tb) f32 -- rank + neg_penalty where the class is absent
             ("wrong"), else -BIG.   (penalty already folded in)
    out_ref: (1, 8, 128) f32 -- per-core-split partial sum (splatted), written
             on the last batch tile of this core's sweep.
    acc_ref: (8, tb) f32 VMEM scratch -- elementwise running accumulator,
             persistent across the "arbitrary" batch-tile axis.
    """
    i = pl.program_id(1)

    @pl.when(i == 0)
    def _():
        acc_ref[...] = jnp.zeros_like(acc_ref)

    lp, tb = w_ref.shape
    kt = lp // _KB                      # static chunk count along "wrong" axis

    def j_body(j, acc):
        # One "correct" rank row, sublane-broadcast to the chunk height.
        # Hoisted out of the k loop so it is built exactly once per j.
        cj = jnp.broadcast_to(c_ref[pl.ds(j, 1), :], (_KB, tb))

        def k_body(kk, a):
            k0 = pl.multiple_of(kk * _KB, _KB)
            wk = w_ref[pl.ds(k0, _KB), :]               # (8, tb)
            # relu(neg_penalty + wrong - correct); masked pairs hit the +/-BIG
            # sentinels and land far below zero, so relu kills them for free.
            return a + jnp.maximum(wk - cj, 0.0)        # pure vreg VALU work

        return lax.fori_loop(0, kt, k_body, acc, unroll=k_unroll)

    # Carry the partial sum through the loops in vector registers; touch the
    # VMEM accumulator only once per grid step.
    zero = jnp.zeros((_KB, tb), jnp.float32)
    acc_ref[...] += lax.fori_loop(0, n_classes, j_body, zero)

    @pl.when(i == pl.num_programs(1) - 1)
    def _():
        # Single cross-lane/sublane reduction per core split, once at the end.
        total = jnp.sum(acc_ref[...])
        out_ref[...] = jnp.broadcast_to(total, out_ref.shape)


def ranking_loss(ranks, labels, class_ids_loaded, neg_penalty=0.03,
                 tile_b=None, num_core_splits=2):
    """Pallas TPU implementation of RankingLoss.forward (returns a scalar)."""
    assert ranks.ndim == 2 and labels.shape == ranks.shape
    B, _ = ranks.shape
    ids = jnp.asarray(class_ids_loaded)
    L = int(ids.shape[0])

    # Column-select the loaded classes up front (same gather the PyTorch module
    # does); the kernel then only sweeps the L loaded classes.
    ranks_l = ranks[:, ids].astype(jnp.float32)            # (B, L)
    labels_l = labels[:, ids].astype(jnp.float32)          # (B, L)

    # NOTE: like the PyTorch module, labels must be exactly 0.0 / 1.0.
    pos = labels_l == 1.0
    neg = labels_l == 0.0

    # Fold masks + neg_penalty into the two rank matrices (O(B*L) wrapper work
    # vs O(B*L^2) kernel work); the kernel streams straight from these refs.
    c_mat = jnp.where(pos, ranks_l, _BIG)                                # correct
    w_mat = jnp.where(neg, ranks_l + jnp.float32(neg_penalty), -_BIG)    # wrong

    # Lane-dense batch layout: classes on sublanes, batch on lanes.
    cT = c_mat.T                                            # (L, B)
    wT = w_mat.T

    Lp = _round_up(max(L, 1), _KB)

    # Generation-aware VMEM budget (v5e/v6e: 128 MiB, v7x: 64 MiB physical).
    try:
        phys_vmem = int(pltpu.get_tpu_info().vmem_capacity_bytes)
    except Exception:  # interpret mode / unknown backend
        phys_vmem = 64 * 1024 * 1024
    budget = phys_vmem // 3          # for the double-buffered f32 inputs

    # Batch tile (lanes per grid step) from input double-buffering:
    #   2 inputs * 2 pipeline buffers * Lp * tb * 4 B <= budget.
    if tile_b is None:
        tb = budget // (16 * Lp)
        tb = max(128, min(1024, (tb // 128) * 128))  # 1024 cap keeps carries in vregs
    else:
        tb = max(128, _round_up(int(tile_b), 128))

    # Batch core-split (v7x has 2 TensorCores; serialized and harmless on
    # 1-TC chips).  TODO(synk): switch the leading axis to pltpu.CORE_PARALLEL
    # once running exclusively on multi-TC parts.
    nc = max(1, int(num_core_splits))
    tb = min(tb, _round_up(pl.cdiv(B, nc), 128))   # no tile wider than a core's share
    nc = min(nc, pl.cdiv(B, tb))                   # drop pure-padding core splits
    nt = pl.cdiv(pl.cdiv(B, nc), tb)               # batch tiles per core split
    Bp = nc * nt * tb

    # Padded class rows / batch columns carry the sentinels, so they contribute
    # exactly 0 to every pair.
    cT = jnp.pad(cT, ((0, Lp - L), (0, Bp - B)), constant_values=_BIG)
    wT = jnp.pad(wT, ((0, Lp - L), (0, Bp - B)), constant_values=-_BIG)

    kt = Lp // _KB
    k_unroll = kt if kt <= 16 else max(d for d in (8, 4, 2, 1) if kt % d == 0)

    kernel = functools.partial(_ranking_loss_kernel, n_classes=L, k_unroll=k_unroll)

    partials = pl.pallas_call(
        kernel,
        out_shape=jax.ShapeDtypeStruct((nc, 8, 128), jnp.float32),
        grid_spec=pltpu.PrefetchScalarGridSpec(
            num_scalar_prefetch=0,
            grid=(nc, nt),
            in_specs=[
                pl.BlockSpec((Lp, tb), lambda c, i: (0, c * nt + i)),   # correct
                pl.BlockSpec((Lp, tb), lambda c, i: (0, c * nt + i)),   # wrong
            ],
            out_specs=pl.BlockSpec((1, 8, 128), lambda c, i: (c, 0, 0)),
            scratch_shapes=[pltpu.VMEM((_KB, tb), jnp.float32)],
        ),
        compiler_params=pltpu.CompilerParams(
            # Core-split axis is "parallel"; the batch-tile axis carries the
            # per-core accumulator -> "arbitrary".
            dimension_semantics=("parallel", "arbitrary"),
            vmem_limit_bytes=int(phys_vmem * 3 // 4),
        ),
    )(cT, wT)

    # TODO(synk): for extremely large loaded-class counts (16*Lp*128 bytes
    # approaching the VMEM budget), additionally tile the class axis.
    return jnp.sum(partials[:, 0, 0]) / jnp.float32(B)


def _reference(ranks, labels, class_ids_loaded, neg_penalty=0.03):
    # Pure-JAX vectorized equivalent of the PyTorch per-row loop.
    labels_l = labels[:, class_ids_loaded].astype(jnp.float32)
    ranks_l = ranks[:, class_ids_loaded].astype(jnp.float32)
    pos = (labels_l == 1.0).astype(jnp.float32)
    neg = (labels_l == 0.0).astype(jnp.float32)
    diff = neg_penalty + ranks_l[:, None, :] - ranks_l[:, :, None]
    pen = jnp.maximum(diff, 0.0) * pos[:, :, None] * neg[:, None, :]
    return jnp.sum(pen) / ranks.shape[0]


if __name__ == "__main__":
    key = jax.random.PRNGKey(0)
    k1, k2, k3, k4 = jax.random.split(key, 4)

    # Case 1: tiny shapes (single tile, single core split).
    B1, C1 = 16, 16
    ranks1 = jax.random.normal(k1, (B1, C1), dtype=jnp.float32)
    labels1 = jax.random.bernoulli(k2, 0.5, (B1, C1)).astype(jnp.float32)
    ids1 = jnp.array([0, 1, 2, 3, 5, 7, 8, 10, 12, 15], dtype=jnp.int32)

    loss1 = jax.block_until_ready(ranking_loss(ranks1, labels1, ids1, neg_penalty=0.03))
    ref1 = _reference(ranks1, labels1, ids1, neg_penalty=0.03)
    assert jnp.allclose(loss1, ref1, rtol=1e-4, atol=1e-5), (loss1, ref1)

    # Case 2: forces the multi-tile accumulator path, the 2-way core split,
    # and class/batch padding (L=12 -> Lp=16, B=300 -> Bp=512, tile_b=128).
    B2, C2 = 300, 21
    ranks2 = jax.random.normal(k3, (B2, C2), dtype=jnp.float32)
    labels2 = jax.random.bernoulli(k4, 0.4, (B2, C2)).astype(jnp.float32)
    ids2 = jnp.array([0, 2, 3, 4, 6, 9, 11, 12, 14, 17, 18, 20], dtype=jnp.int32)

    loss2 = jax.block_until_ready(
        ranking_loss(ranks2, labels2, ids2, neg_penalty=0.03,
                     tile_b=128, num_core_splits=2))
    ref2 = _reference(ranks2, labels2, ids2, neg_penalty=0.03)
    assert jnp.allclose(loss2, ref2, rtol=1e-4, atol=1e-4), (loss2, ref2)

    print("KERNEL_OK")
</pallas_src>

<mosaic_0001>
module attributes {stable_mosaic.version = 11 : i64} {
  func.func @_ranking_loss_kernel(%arg0: i32, %arg1: i32, %arg2: memref<16x128xf32, #tpu.memory_space<vmem>>, %arg3: memref<16x128xf32, #tpu.memory_space<vmem>>, %arg4: memref<1x8x128xf32, #tpu.memory_space<vmem>>, %arg5: memref<8x128xf32, #tpu.memory_space<vmem>>) attributes {dimension_semantics = [#tpu.dimension_semantics<parallel>, #tpu.dimension_semantics<arbitrary>], iteration_bounds = array<i64: 1, 1>, scalar_prefetch = 0 : i64, scratch_operands = 1 : i64, tpu.core_type = #tpu.core_type<tc>, window_params = [{transform_indices = @transform_0, window_bounds = array<i64: 16, 128>}, {transform_indices = @transform_1, window_bounds = array<i64: 16, 128>}, {transform_indices = @transform_2, window_bounds = array<i64: 1, 8, 128>}]} {
    %c0_i32 = arith.constant 0 : i32
    %0 = arith.cmpi eq, %arg1, %c0_i32 : i32
    %1 = arith.extui %0 : i1 to i32
    %c0_i32_0 = arith.constant 0 : i32
    %2 = arith.cmpi ne, %1, %c0_i32_0 : i32
    scf.if %2 {
      %cst_8 = arith.constant 0.000000e+00 : f32
      %12 = vector.broadcast %cst_8 : f32 to vector<8x128xf32>
      %c0_9 = arith.constant 0 : index
      %c0_10 = arith.constant 0 : index
      %13 = vector.load %arg5[%c0_9, %c0_10] : memref<8x128xf32, #tpu.memory_space<vmem>>, vector<8x128xf32>
      tpu.vector_store %arg5[%c0_9, %c0_10], %12 {strides = array<i32>} : memref<8x128xf32, #tpu.memory_space<vmem>>, vector<8x128xf32>,
    } else {
    }
    %cst = arith.constant 0.000000e+00 : f32
    %3 = vector.broadcast %cst : f32 to vector<8x128xf32>
    %c0 = arith.constant 0 : index
    %c0_1 = arith.constant 0 : index
    %4 = vector.load %arg5[%c0, %c0_1] : memref<8x128xf32, #tpu.memory_space<vmem>>, vector<8x128xf32>
    %c0_i32_2 = arith.constant 0 : i32
    %c10_i32 = arith.constant 10 : i32
    %5 = arith.addi %c0_i32_2, %c10_i32 : i32
    %c1_i32 = arith.constant 1 : i32
    %6 = scf.for %arg6 = %c0_i32_2 to %5 step %c1_i32 iter_args(%arg7 = %3) -> (vector<8x128xf32>)  : i32 {
      %12 = arith.index_cast %arg6 : i32 to index
      %c0_8 = arith.constant 0 : index
      %13 = vector.load %arg2[%12, %c0_8] : memref<16x128xf32, #tpu.memory_space<vmem>>, vector<1x128xf32>
      %14 = vector.shape_cast %13 : vector<1x128xf32> to vector<1x128xf32>
      %15 = vector.broadcast %14 : vector<1x128xf32> to vector<8x128xf32>
      %c0_i32_9 = arith.constant 0 : i32
      %c8_i32 = arith.constant 8 : i32
      %16 = arith.muli %c0_i32_9, %c8_i32 : i32
      %17 = tpu.assume_multiple %16, 8 : i32
      %18 = arith.index_cast %17 : i32 to index
      %c0_10 = arith.constant 0 : index
      %19 = vector.load %arg3[%18, %c0_10] : memref<16x128xf32, #tpu.memory_space<vmem>>, vector<8x128xf32>
      %20 = arith.subf %19, %15 : vector<8x128xf32>
      %cst_11 = arith.constant 0.000000e+00 : f32
      %21 = vector.broadcast %cst_11 : f32 to vector<8x128xf32>
      %22 = arith.maximumf %20, %21 : vector<8x128xf32>
      %23 = arith.addf %arg7, %22 : vector<8x128xf32>
      %c1_i32_12 = arith.constant 1 : i32
      %c8_i32_13 = arith.constant 8 : i32
      %24 = arith.muli %c1_i32_12, %c8_i32_13 : i32
      %25 = tpu.assume_multiple %24, 8 : i32
      %26 = arith.index_cast %25 : i32 to index
      %c0_14 = arith.constant 0 : index
      %27 = vector.load %arg3[%26, %c0_14] : memref<16x128xf32, #tpu.memory_space<vmem>>, vector<8x128xf32>
      %28 = arith.subf %27, %15 : vector<8x128xf32>
      %cst_15 = arith.constant 0.000000e+00 : f32
      %29 = vector.broadcast %cst_15 : f32 to vector<8x128xf32>
      %30 = arith.maximumf %28, %29 : vector<8x128xf32>
      %31 = arith.addf %23, %30 : vector<8x128xf32>
      %c2_i32 = arith.constant 2 : i32
      scf.yield %31 : vector<8x128xf32>
    }
    %c10_i32_3 = arith.constant 10 : i32
    %7 = arith.addf %4, %6 : vector<8x128xf32>
    %c0_4 = arith.constant 0 : index
    %c0_5 = arith.constant 0 : index
    %8 = vector.load %arg5[%c0_4, %c0_5] : memref<8x128xf32, #tpu.memory_space<vmem>>, vector<8x128xf32>
    tpu.vector_store %arg5[%c0_4, %c0_5], %7 {strides = array<i32>} : memref<8x128xf32, #tpu.memory_space<vmem>>, vector<8x128xf32>,
    %c0_i32_6 = arith.constant 0 : i32
    %9 = arith.cmpi eq, %arg1, %c0_i32_6 : i32
    %10 = arith.extui %9 : i1 to i32
    %c0_i32_7 = arith.constant 0 : i32
    %11 = arith.cmpi ne, %10, %c0_i32_7 : i32
    scf.if %11 {
      %c0_8 = arith.constant 0 : index
      %c0_9 = arith.constant 0 : index
      %12 = vector.load %arg5[%c0_8, %c0_9] : memref<8x128xf32, #tpu.memory_space<vmem>>, vector<8x128xf32>
      %13 = vector.shape_cast %12 : vector<8x128xf32> to vector<1x8x128xf32>
      %cst_10 = arith.constant dense<0.000000e+00> : vector<1xf32>
      %14 = vector.multi_reduction <add>, %13, %cst_10 [1, 2] : vector<1x8x128xf32> to vector<1xf32>
      %15 = vector.shape_cast %14 : vector<1xf32> to vector<1x1x1xf32>
      %16 = vector.extract %15[0, 0, 0] : f32 from vector<1x1x1xf32>
      %17 = vector.broadcast %16 : f32 to vector<1x8x128xf32>
      %c0_11 = arith.constant 0 : index
      %c0_12 = arith.constant 0 : index
      %c0_13 = arith.constant 0 : index
      %18 = vector.load %arg4[%c0_11, %c0_12, %c0_13] : memref<1x8x128xf32, #tpu.memory_space<vmem>>, vector<1x8x128xf32>
      tpu.vector_store %arg4[%c0_11, %c0_12, %c0_13], %17 {strides = array<i32>} : memref<1x8x128xf32, #tpu.memory_space<vmem>>, vector<1x8x128xf32>,
    } else {
    }
    return
  }
  func.func @transform_0(%arg0: i32, %arg1: i32) -> (i32, i32) {
    %c1_i32 = arith.constant 1 : i32
    %0 = arith.muli %arg0, %c1_i32 : i32
    %1 = arith.addi %0, %arg1 : i32
    %c0_i32 = arith.constant 0 : i32
    %c0_i32_0 = arith.constant 0 : i32
    return %c0_i32, %1 : i32, i32
  }
  func.func @transform_1(%arg0: i32, %arg1: i32) -> (i32, i32) {
    %c1_i32 = arith.constant 1 : i32
    %0 = arith.muli %arg0, %c1_i32 : i32
    %1 = arith.addi %0, %arg1 : i32
    %c0_i32 = arith.constant 0 : i32
    %c0_i32_0 = arith.constant 0 : i32
    return %c0_i32, %1 : i32, i32
  }
  func.func @transform_2(%arg0: i32, %arg1: i32) -> (i32, i32, i32) {
    %c0_i32 = arith.constant 0 : i32
    %c0_i32_0 = arith.constant 0 : i32
    %c0_i32_1 = arith.constant 0 : i32
    return %arg0, %c0_i32, %c0_i32_0 : i32, i32, i32
  }
}

</mosaic_0001>

<bundles_post_ra>
// kernel: tpu_custom_call.1
= control target key start
LH: loop header
LB: loop body
LE: loop exit
PB: predicated region body
PF: predicated region fallthrough
CT: control target
= control target key end

     0   :  { %7 = vsyncpa [#allocation4], 0  ;;  %s269_s0 = inlined_call_operand.hbm [shape: f32[16,128], index: 0, kind: input, shape index: {}]   ;;  %s270_s1 = inlined_call_operand.hbm [shape: f32[16,128], index: 1, kind: input, shape index: {}]   ;;  %s271_s2 = inlined_call_operand.hbm [shape: f32[1,8,128], index: 2, kind: output, shape index: {}]  }
   0x1   :  { %8 = vsyncpa [#allocation7], 0 }
   0x2   :  { %9 = vsyncpa [#allocation5], 0  ;;  %s17_s11 = sshll.u32 %s269_s0, 4  ;;  %s240_s12 = smov [#allocation3]   ;;  %s18_s11 = int_to_ptr.hbm [resolvable:$true] %s17_s11 }
   0x3   :  { %s19_s13 = sshll.u32 %s240_s12, 4  ;;  %s33_s16 = sshll.u32 %s270_s1, 4  ;;  %s20_s13 = int_to_ptr.vmem [resolvable:$true] %s19_s13  ;;  %s34_s16 = int_to_ptr.hbm [resolvable:$true] %s33_s16 }
   0x4   :  { %s241_s17 = smov 128   ;;  %s242_s18 = smov 8  }
   0x5   :  { %25 = dma.hbm_to_vmem [thread:$0]  %s18_s11, 256, %s20_s13, [#allocation4], %s241_s17, %s241_s17, %s242_s18  }
   0x6   :  { %s243_s19 = smov [#allocation6]  }
   0x7   :  { %s35_s20 = sshll.u32 %s243_s19, 4  ;;  %s36_s20 = int_to_ptr.vmem [resolvable:$true] %s35_s20 }
   0x8   :  { %41 = dma.hbm_to_vmem [thread:$0]  %s34_s16, 256, %s36_s20, [#allocation7], %s241_s17, %s241_s17, %s242_s18  }
   0x9   :  { %226 = dma.done.wait [#allocation4], 256  }
   0xa   :  { %227 = vsyncadd [#allocation4], 4294967040 }
   0xb   :  { %228 = dma.done.wait [#allocation7], 256  }
   0xc   :  { %229 = vsyncadd [#allocation7], 4294967040  ;;  %v232_v0 = vmov 0.0   ;;  %s236_s0 = smov 0  }
   0xd LB: > { %v68_v1 = vld [vmem:[#allocation6] sm:$0xff]  ;;  %v73_v2 = vld [vmem:[#allocation6 + $0x8] sm:$0xff]  ;;  %s65_s1 = scalar_lea.vmem [#allocation3], %s238_s0  ;;  %s63_s0 = sadd.s32 1, %s238_s0   ;;  %s238_s0 = sphi %s236_s0, %s63_s0   ;;  %v234_v0 = vphi %v232_v0, %v233_v0  }
   0xe   : > { %v145_v3 = vld [vmem:[%s65_s1] ss:$0 sm:$0xff]  ;;  %p60_p0 = scmp.ge.s32.totalorder %s63_s0, 10  }
   0xf   : > { %v69_v4 = vsub.f32 %v68_v1, %v145_v3  ;;  %v74_v5 = vsub.f32 %v73_v2, %v145_v3  ;;  %s244_s21 = smov (%p60_p0), [#allocation8]   ;;  %s101_s25 = sshll.u32 (%p60_p0), %s271_s2, 4  ;;  %s102_s25 = int_to_ptr.hbm [resolvable:$true] %s101_s25 }
  0x10   :  { %s99_s22 = sshll.u32 (%p60_p0), %s244_s21, 4  ;;  %s100_s22 = int_to_ptr.vmem [resolvable:$true] %s99_s22 }
  0x11   : > { %v70_v6 = vmax.f32 %v69_v4, 0.0  ;;  %v75_v7 = vmax.f32 %v74_v5, 0.0 }
  0x13   : > { %v71_v8 = vadd.f32 %v234_v0, %v70_v6  ;;  %62 = sbr.rel (!%p60_p0) target bundleno = 13 (0xd), region = 55 }
  0x15   : > { %v76_v9 = vadd.f32 %v75_v7, %v71_v8  }
  0x17   : > { %v233_v0 = vmov %v76_v9   ;;  %83 = vadd.xlane.f32.xlu0 (%p60_p0), %v76_v9 }
  0x8a   :  { %v84_v10 = vpop.xlane.xlu0 %83 }
  0x8b   :  { %v85_v11 = vrot.slane %v84_v10, 4 }
  0x8d   :  { %v86_v12 = vadd.f32 %v85_v11, %v84_v10 }
  0x8f   :  { %v87_v13 = vrot.slane %v86_v12, 2 }
  0x91   :  { %v88_v14 = vadd.f32 %v87_v13, %v86_v12 }
  0x93   :  { %v89_v15 = vrot.slane %v88_v14, 1 }
  0x95   :  { %v90_v16 = vadd.f32 %v89_v15, %v88_v14 }
  0x97   :  { %121 = vpush %v90_v16 }
  0xc8   :  { %s122_s26 = spop %121 }
  0xc9   :  { %v92_v17 = vstv %s122_s26 }
  0xca   :  { %93 = vst [vmem:[#allocation8] sm:$0xff] %v92_v17 }
  0xcb   :  { %104 = dma.vmem_to_hbm [thread:$0]  %s100_s22, 128, %s102_s25, [#allocation5]  }
  0xcc   :  { %230 = dma.done.wait [#allocation5], 128  }
  0xcd   :  { %231 = vsyncadd [#allocation5], 4294967168 }
  0xce   :  { %109 = vsyncpa [#allocation4], 1 }
  0xcf   :  { %110 = vsyncpa [#allocation7], 1 }
  0xd0   :  { %111 = vsyncpa [#allocation5], 1 }

</bundles_post_ra>
